<compile_context>
chip_gen: v7x
topology: tpu7x:2x2x1
jax: 0.10.0
libtpu: 0.0.40
codegen_flags: <defaults>
</compile_context>

<pallas_src>
import functools

import jax
import jax.numpy as jnp
from jax.experimental import pallas as pl
from jax.experimental.pallas import tpu as pltpu


def _round_up(a: int, b: int) -> int:
    return (a + b - 1) // b * b


def _rsn_kernel(n_hidden_layers, compute_dtype, *refs):
    """Fused MLP kernel.

    refs = (x_ref,
            w0_ref, b0_ref, ..., w{L-1}_ref, b{L-1}_ref,   # hidden (ReLU) layers
            wo_ref, bo_ref,                                 # output layer (lane-padded)
            y_ref)
    """
    x_ref = refs[0]
    y_ref = refs[-1]
    param_refs = refs[1:-1]

    # x already arrives in compute_dtype (cast in the wrapper so DMA bytes shrink too).
    h = x_ref[...]

    # Hidden layers: Linear (MXU, fp32 accumulate) + bias + ReLU (VPU, fp32).
    for l in range(n_hidden_layers):
        w_ref = param_refs[2 * l]
        b_ref = param_refs[2 * l + 1]
        acc = jnp.dot(h, w_ref[...], preferred_element_type=jnp.float32)
        acc = acc + b_ref[...]                       # bias is fp32, (1, out) broadcast
        h = jnp.maximum(acc, 0.0).astype(compute_dtype)

    # Output layer: Linear, no activation (out_type == 'linear').
    wo_ref = param_refs[-2]
    bo_ref = param_refs[-1]
    y = jnp.dot(h, wo_ref[...], preferred_element_type=jnp.float32) + bo_ref[...]
    y_ref[...] = y.astype(y_ref.dtype)               # full 128-lane (unmasked) store


def rsn_forward(x, weights, biases, *, tile_n=256, compute_dtype=jnp.bfloat16):
    """Run the fused RSN forward pass.

    Args:
      x:       [N, architecture[0]] float32 activations.
      weights: list of arrays, each [in, out] (already transposed from PyTorch
               [out, in]).  Last entry is the output layer (no ReLU).
      biases:  list of arrays, each [out].
      tile_n:  batch-tile rows per grid step (sweep 256-512; sublane-aligned).
      compute_dtype: matmul operand dtype (bf16 fast path; fp32 debug path).
    Returns:
      y: [N, dim_y] float32.
    """
    n, d_in = x.shape
    dim_y = weights[-1].shape[1]
    n_hidden = len(weights) - 1

    # ---- lane-dense output padding: W_out [h, dim_y] -> [h, 128k], b_out likewise.
    d_out_pad = _round_up(max(dim_y, 128), 128)
    w_out = jnp.pad(weights[-1], ((0, 0), (0, d_out_pad - dim_y)))
    b_out = jnp.pad(biases[-1], ((0, d_out_pad - dim_y),))

    # ---- batch tiling: sublane-aligned tile, pad N so every block is full.
    row_align = 16 if compute_dtype == jnp.bfloat16 else 8
    tile = min(tile_n, _round_up(n, row_align))
    tile = _round_up(tile, row_align)
    n_pad = _round_up(n, tile)
    grid = (n_pad // tile,)

    # ---- operand dtypes: matmul operands in compute_dtype, biases fp32 (1, out).
    x_c = x.astype(compute_dtype)
    if n_pad != n:
        x_c = jnp.pad(x_c, ((0, n_pad - n), (0, 0)))
    ws = [w.astype(compute_dtype) for w in weights[:-1]] + [w_out.astype(compute_dtype)]
    bs = [b.reshape(1, -1).astype(jnp.float32) for b in biases[:-1]] + [
        b_out.reshape(1, -1).astype(jnp.float32)
    ]

    in_specs = [pl.BlockSpec((tile, d_in), lambda i: (i, 0))]
    flat_params = []
    for w, b in zip(ws, bs):
        in_specs.append(pl.BlockSpec(w.shape, lambda i: (0, 0)))   # resident, block 0
        in_specs.append(pl.BlockSpec(b.shape, lambda i: (0, 0)))
        flat_params.append(w)
        flat_params.append(b)

    out_spec = pl.BlockSpec((tile, d_out_pad), lambda i: (i, 0))

    # ---- advisory cost estimate for the XLA scheduler.
    dims = [d_in] + [w.shape[1] for w in weights]
    flops = 2 * n * sum(dims[i] * dims[i + 1] for i in range(len(dims) - 1))
    bytes_accessed = (
        x_c.size * x_c.dtype.itemsize
        + sum(a.size * a.dtype.itemsize for a in flat_params)
        + n_pad * d_out_pad * 4
    )
    cost = pl.CostEstimate(flops=flops, transcendentals=0, bytes_accessed=bytes_accessed)

    kernel = functools.partial(_rsn_kernel, n_hidden, compute_dtype)

    y_pad = pl.pallas_call(
        kernel,
        out_shape=jax.ShapeDtypeStruct((n_pad, d_out_pad), jnp.float32),
        grid_spec=pltpu.PrefetchScalarGridSpec(
            num_scalar_prefetch=0,
            grid=grid,
            in_specs=in_specs,
            out_specs=out_spec,
        ),
        compiler_params=pltpu.CompilerParams(
            dimension_semantics=("parallel",),   # batch axis -> megacore sharding on v7x
        ),
        cost_estimate=cost,
    )(x_c, *flat_params)

    return y_pad[:n, :dim_y]


def init_rsn_params(key, architecture, dim_y):
    """Deterministic init matching PyTorch nn.Linear default (U[-1/sqrt(fan_in), ..])."""
    dims = list(architecture) + [dim_y]
    weights, biases = [], []
    for i in range(len(dims) - 1):
        fan_in, fan_out = dims[i], dims[i + 1]
        key, kw, kb = jax.random.split(key, 3)
        bound = 1.0 / jnp.sqrt(jnp.float32(fan_in))
        # Stored directly as [in, out] (PyTorch stores [out, in]; forward uses x @ W.T).
        w = jax.random.uniform(kw, (fan_in, fan_out), jnp.float32, -bound, bound)
        b = jax.random.uniform(kb, (fan_out,), jnp.float32, -bound, bound)
        weights.append(w)
        biases.append(b)
    return weights, biases


def rsn_reference(x, weights, biases):
    """Pure-JAX fp32 reference for correctness checking."""
    h = x
    for w, b in zip(weights[:-1], biases[:-1]):
        h = jnp.maximum(h @ w + b, 0.0)
    return h @ weights[-1] + biases[-1]


if __name__ == "__main__":
    # RSN(architecture=[32, 64, 64], dim_y=4).
    architecture = [32, 64, 64]
    dim_y = 4

    key = jax.random.PRNGKey(0)
    key, kx_big, kx_small = jax.random.split(key, 3)
    weights, biases = init_rsn_params(key, architecture, dim_y)

    # Batch large enough to give a 2-step grid (pipelined DMA, 2 TCs on v7x).
    x_big = jax.random.normal(kx_big, (512, architecture[0]), jnp.float32)
    # Small batch (exercises batch padding / writeback slicing).
    x_small = jax.random.normal(kx_small, (8, architecture[0]), jnp.float32)

    y_ref_big = rsn_reference(x_big, weights, biases)
    y_ref_small = rsn_reference(x_small, weights, biases)

    # bf16-operand fast path (fp32 accumulate): loose tolerance vs fp32 reference.
    y_big = jax.block_until_ready(rsn_forward(x_big, weights, biases))
    assert y_big.shape == (512, dim_y)
    assert jnp.allclose(y_big, y_ref_big, atol=5e-2, rtol=5e-2), "bf16 path mismatch (big batch)"

    y_small = jax.block_until_ready(rsn_forward(x_small, weights, biases))
    assert y_small.shape == (8, dim_y)
    assert jnp.allclose(y_small, y_ref_small, atol=5e-2, rtol=5e-2), "bf16 path mismatch (small batch)"

    # fp32 debug path: tight tolerance vs fp32 reference.
    y_f32 = jax.block_until_ready(
        rsn_forward(x_big, weights, biases, compute_dtype=jnp.float32)
    )
    assert y_f32.shape == (512, dim_y)
    assert jnp.allclose(y_f32, y_ref_big, atol=1e-5, rtol=1e-5), "fp32 path mismatch"

    print("KERNEL_OK")
</pallas_src>

<mosaic_0001>
module attributes {stable_mosaic.version = 11 : i64} {
  func.func @_rsn_kernel(%arg0: i32, %arg1: memref<256x32xbf16, #tpu.memory_space<vmem>>, %arg2: memref<32x64xbf16, #tpu.memory_space<vmem>>, %arg3: memref<1x64xf32, #tpu.memory_space<vmem>>, %arg4: memref<64x64xbf16, #tpu.memory_space<vmem>>, %arg5: memref<1x64xf32, #tpu.memory_space<vmem>>, %arg6: memref<64x128xbf16, #tpu.memory_space<vmem>>, %arg7: memref<1x128xf32, #tpu.memory_space<vmem>>, %arg8: memref<256x128xf32, #tpu.memory_space<vmem>>) attributes {dimension_semantics = [#tpu.dimension_semantics<parallel>], iteration_bounds = array<i64: 2>, scalar_prefetch = 0 : i64, scratch_operands = 0 : i64, tpu.core_type = #tpu.core_type<tc>, window_params = [{transform_indices = @transform_0, window_bounds = array<i64: 256, 32>}, {pipeline_mode = #tpu.pipeline_mode<synchronous>, transform_indices = @transform_1, window_bounds = array<i64: 32, 64>}, {pipeline_mode = #tpu.pipeline_mode<synchronous>, transform_indices = @transform_2, window_bounds = array<i64: 1, 64>}, {pipeline_mode = #tpu.pipeline_mode<synchronous>, transform_indices = @transform_3, window_bounds = array<i64: 64, 64>}, {pipeline_mode = #tpu.pipeline_mode<synchronous>, transform_indices = @transform_4, window_bounds = array<i64: 1, 64>}, {pipeline_mode = #tpu.pipeline_mode<synchronous>, transform_indices = @transform_5, window_bounds = array<i64: 64, 128>}, {pipeline_mode = #tpu.pipeline_mode<synchronous>, transform_indices = @transform_6, window_bounds = array<i64: 1, 128>}, {transform_indices = @transform_7, window_bounds = array<i64: 256, 128>}]} {
    %c0 = arith.constant 0 : index
    %c0_0 = arith.constant 0 : index
    %0 = vector.load %arg1[%c0, %c0_0] : memref<256x32xbf16, #tpu.memory_space<vmem>>, vector<256x32xbf16>
    %c0_1 = arith.constant 0 : index
    %c0_2 = arith.constant 0 : index
    %1 = vector.load %arg2[%c0_1, %c0_2] : memref<32x64xbf16, #tpu.memory_space<vmem>>, vector<32x64xbf16>
    %cst = arith.constant dense<0.000000e+00> : vector<256x64xf32>
    %2 = tpu.matmul %0, %1, %cst {dimension_numbers = #tpu.dot_dimension_numbers<[1], [0], [0], [1], [0, 0, 1, 1], [], []>} : vector<256x32xbf16>, vector<32x64xbf16>, vector<256x64xf32> -> vector<256x64xf32>
    %c0_3 = arith.constant 0 : index
    %c0_4 = arith.constant 0 : index
    %3 = vector.load %arg3[%c0_3, %c0_4] : memref<1x64xf32, #tpu.memory_space<vmem>>, vector<1x64xf32>
    %4 = vector.broadcast %3 : vector<1x64xf32> to vector<256x64xf32>
    %5 = arith.addf %2, %4 : vector<256x64xf32>
    %cst_5 = arith.constant 0.000000e+00 : f32
    %6 = vector.broadcast %cst_5 : f32 to vector<256x64xf32>
    %7 = arith.maximumf %5, %6 : vector<256x64xf32>
    %8 = arith.truncf %7 : vector<256x64xf32> to vector<256x64xbf16>
    %c0_6 = arith.constant 0 : index
    %c0_7 = arith.constant 0 : index
    %9 = vector.load %arg4[%c0_6, %c0_7] : memref<64x64xbf16, #tpu.memory_space<vmem>>, vector<64x64xbf16>
    %cst_8 = arith.constant dense<0.000000e+00> : vector<256x64xf32>
    %10 = tpu.matmul %8, %9, %cst_8 {dimension_numbers = #tpu.dot_dimension_numbers<[1], [0], [0], [1], [0, 0, 1, 1], [], []>} : vector<256x64xbf16>, vector<64x64xbf16>, vector<256x64xf32> -> vector<256x64xf32>
    %c0_9 = arith.constant 0 : index
    %c0_10 = arith.constant 0 : index
    %11 = vector.load %arg5[%c0_9, %c0_10] : memref<1x64xf32, #tpu.memory_space<vmem>>, vector<1x64xf32>
    %12 = vector.broadcast %11 : vector<1x64xf32> to vector<256x64xf32>
    %13 = arith.addf %10, %12 : vector<256x64xf32>
    %cst_11 = arith.constant 0.000000e+00 : f32
    %14 = vector.broadcast %cst_11 : f32 to vector<256x64xf32>
    %15 = arith.maximumf %13, %14 : vector<256x64xf32>
    %16 = arith.truncf %15 : vector<256x64xf32> to vector<256x64xbf16>
    %c0_12 = arith.constant 0 : index
    %c0_13 = arith.constant 0 : index
    %17 = vector.load %arg6[%c0_12, %c0_13] : memref<64x128xbf16, #tpu.memory_space<vmem>>, vector<64x128xbf16>
    %cst_14 = arith.constant dense<0.000000e+00> : vector<256x128xf32>
    %18 = tpu.matmul %16, %17, %cst_14 {dimension_numbers = #tpu.dot_dimension_numbers<[1], [0], [0], [1], [0, 0, 1, 1], [], []>} : vector<256x64xbf16>, vector<64x128xbf16>, vector<256x128xf32> -> vector<256x128xf32>
    %c0_15 = arith.constant 0 : index
    %c0_16 = arith.constant 0 : index
    %19 = vector.load %arg7[%c0_15, %c0_16] : memref<1x128xf32, #tpu.memory_space<vmem>>, vector<1x128xf32>
    %20 = vector.broadcast %19 : vector<1x128xf32> to vector<256x128xf32>
    %21 = arith.addf %18, %20 : vector<256x128xf32>
    %c0_17 = arith.constant 0 : index
    %c0_18 = arith.constant 0 : index
    %22 = vector.load %arg8[%c0_17, %c0_18] : memref<256x128xf32, #tpu.memory_space<vmem>>, vector<256x128xf32>
    tpu.vector_store %arg8[%c0_17, %c0_18], %21 {strides = array<i32>} : memref<256x128xf32, #tpu.memory_space<vmem>>, vector<256x128xf32>,
    return
  }
  func.func @transform_0(%arg0: i32) -> (i32, i32) {
    %c0_i32 = arith.constant 0 : i32
    %c0_i32_0 = arith.constant 0 : i32
    return %arg0, %c0_i32 : i32, i32
  }
  func.func @transform_1(%arg0: i32) -> (i32, i32) {
    %c0_i32 = arith.constant 0 : i32
    %c0_i32_0 = arith.constant 0 : i32
    %c0_i32_1 = arith.constant 0 : i32
    return %c0_i32, %c0_i32_0 : i32, i32
  }
  func.func @transform_2(%arg0: i32) -> (i32, i32) {
    %c0_i32 = arith.constant 0 : i32
    %c0_i32_0 = arith.constant 0 : i32
    %c0_i32_1 = arith.constant 0 : i32
    return %c0_i32, %c0_i32_0 : i32, i32
  }
  func.func @transform_3(%arg0: i32) -> (i32, i32) {
    %c0_i32 = arith.constant 0 : i32
    %c0_i32_0 = arith.constant 0 : i32
    %c0_i32_1 = arith.constant 0 : i32
    return %c0_i32, %c0_i32_0 : i32, i32
  }
  func.func @transform_4(%arg0: i32) -> (i32, i32) {
    %c0_i32 = arith.constant 0 : i32
    %c0_i32_0 = arith.constant 0 : i32
    %c0_i32_1 = arith.constant 0 : i32
    return %c0_i32, %c0_i32_0 : i32, i32
  }
  func.func @transform_5(%arg0: i32) -> (i32, i32) {
    %c0_i32 = arith.constant 0 : i32
    %c0_i32_0 = arith.constant 0 : i32
    %c0_i32_1 = arith.constant 0 : i32
    return %c0_i32, %c0_i32_0 : i32, i32
  }
  func.func @transform_6(%arg0: i32) -> (i32, i32) {
    %c0_i32 = arith.constant 0 : i32
    %c0_i32_0 = arith.constant 0 : i32
    %c0_i32_1 = arith.constant 0 : i32
    return %c0_i32, %c0_i32_0 : i32, i32
  }
  func.func @transform_7(%arg0: i32) -> (i32, i32) {
    %c0_i32 = arith.constant 0 : i32
    %c0_i32_0 = arith.constant 0 : i32
    return %arg0, %c0_i32 : i32, i32
  }
}

</mosaic_0001>

<bundles_post_ra>
// kernel: tpu_custom_call.1
= control target key start
LH: loop header
LB: loop body
LE: loop exit
PB: predicated region body
PF: predicated region fallthrough
CT: control target
= control target key end

     0   :  { %12 = vsyncpa [#allocation3], 0  ;;  %s2123_s0 = inlined_call_operand.vmem [shape: bf16[512,32], index: 0, kind: input, shape index: {}]   ;;  %s2124_s1 = inlined_call_operand.vmem [shape: bf16[32,64], index: 1, kind: input, shape index: {}]   ;;  %s2125_s2 = inlined_call_operand.vmem [shape: f32[1,64], index: 2, kind: input, shape index: {}]   ;;  %s2126_s3 = inlined_call_operand.vmem [shape: bf16[64,64], index: 3, kind: input, shape index: {}]   ;;  %s2127_s4 = inlined_call_operand.vmem [shape: f32[1,64], index: 4, kind: input, shape index: {}]   ;;  %s2128_s5 = inlined_call_operand.vmem [shape: bf16[64,128], index: 5, kind: input, shape index: {}]   ;;  %s2129_s6 = inlined_call_operand.vmem [shape: f32[1,128], index: 6, kind: input, shape index: {}]   ;;  %s2130_s7 = inlined_call_operand.hbm [shape: f32[512,128], index: 7, kind: output, shape index: {}]  }
   0x1   :  { %14 = vsyncpa [#allocation3 + $0x1], 0  ;;  %s1769_s24 = smov 0   ;;  %s1771_s25 = smov 0  }
   0x2   :  { %s1773_s26 = smov 0   ;;  %s1775_s27 = smov 0  }
   0x3 LB: > { %s1790_s28 = sadd.s32 4294967295, %s1724_s27   ;;  %s1327_s29 = sadd.s32 4294967294, %s1724_s27   ;;  %s1724_s27 = sphi %s1775_s27, %s2136_s27   ;;  %s1720_s26 = sphi %s1773_s26, %s2135_s26   ;;  %s1716_s25 = sphi %s1771_s25, %s2134_s25   ;;  %s1712_s24 = sphi %s1769_s24, %s2133_s24  }
   0x4   : > { %s1794_s30 = sadd.s32 1, %s1724_s27   ;;  %s179_s8 = sadd.s32 1, %s1720_s26 }
   0x5   : > { %s176_s9 = ssub.s32 %s1724_s27, %s1794_s30  ;;  %p189_p0 = scmp.ne.s32.totalorder %s1720_s26, %s1716_s25 }
   0x6   : > { %p177_p1 = scmp.eq.s32.totalorder %s176_s9, 0  ;;  %p190_p2 = scmp.eq.s32.totalorder %s1790_s28, 1 }
   0x7   : > { %p195_p3 = scmp.ne.s32.totalorder %s1716_s25, %s1712_s24  ;;  %p196_p4 = scmp.eq.s32.totalorder %s1327_s29, 1 }
   0x8   : > { %s1805_s10 = scalar_select %p177_p1, %s1720_s26, %s179_s8  }
   0x9   : > { %p1807_p5 = por %p190_p2, %p189_p0  ;;  %p1811_p6 = por %p196_p4, %p195_p3 }
   0xa   : > { %p1330_p7 = scmp.ge.s32.totalorder %s1724_s27, 1  ;;  %p241_p8 = scmp.lt.s32.totalorder %s1724_s27, 3 }
   0xc   : > { %p242_p9 = pnand %p1330_p7, %p241_p8 }
   0xd   : > { %v1636_v0 = vld [vmem:[%s2124_s1] sm:$0xff] (!%p242_p9)   ;;  %s1332_s15 = sshll.u32 (!%p242_p9), %s1790_s28, 5  ;;  %v1637_v1 = vld [vmem:[%s2124_s1 + $0x8] sm:$0xff] (!%p242_p9)   ;;  %vm416_vm0 = vcmask (!%p242_p9), 261120   ;;  %v1656_v12 = vld [vmem:[%s2126_s3 + $0x10] sm:$0xff] (!%p242_p9)   ;;  %vm713_vm1 = vcmask (!%p242_p9), 523264  }
   0xe   : > { %245 = sbr.rel (%p242_p9) target bundleno = 758 (0x2f6), region = 48  ;;  %p274_p10 = scmp.lt.s32.totalorder (!%p242_p9), %s1332_s15, 63  ;;  %1475 = vmatprep.subr.bf16.mxu0 (!%p242_p9), %v1636_v0  ;;  %1591 = vmatprep.subr.bf16.mxu1 (!%p242_p9), %v1636_v0  ;;  %v1654_v2 = vld [vmem:[%s2126_s3] sm:$0xff] (!%p242_p9)   ;;  %v1655_v9 = vld [vmem:[%s2126_s3 + $0x8] sm:$0xff] (!%p242_p9)   ;;  %v1657_v21 = vld [vmem:[%s2126_s3 + $0x18] sm:$0xff] (!%p242_p9)  }
   0xf   : > { %1476 = vmatpush3.bf16.msra.mxu0 (!%p242_p9), %v1636_v0  ;;  %1593 = vmatpush3.bf16.msra.mxu1 (!%p242_p9), %v1636_v0  ;;  %v1658_v22 = vld [vmem:[%s2128_s5] sm:$0xff] (!%p242_p9)   ;;  %v1659_v23 = vld [vmem:[%s2128_s5 + $0x8] sm:$0xff] (!%p242_p9)   ;;  %v1660_v24 = vld [vmem:[%s2128_s5 + $0x10] sm:$0xff] (!%p242_p9)   ;;  %s270_s14 = sand.u32 (!%p242_p9), 1, %s1716_s25   ;;  %s1416_s19 = sshll.u32 (!%p242_p9), %s1790_s28, 12 }
  0x10   : > { %1477 = vmatprep.subr.bf16.mxu0 (!%p242_p9), %v1637_v1  ;;  %1592 = vmatprep.subr.bf16.mxu1 (!%p242_p9), %v1637_v1  ;;  %v1885_v25 = vld [vmem:[%s2125_s2] ss:$0 sm:$0xff] (!%p242_p9)  ;;  %s2082_s28 = scalar_lea.sflag (!%p242_p9), [#allocation3], %s270_s14  ;;  %s1726_s8 = smov (!%p242_p9), [#allocation2]  }
  0x11   : > { %s1666_s9 = sshll.u32 (!%p242_p9), %s1726_s8, 4  ;;  %s1667_s9 = int_to_ptr.vmem [resolvable:$false] %s1666_s9 }
  0x12   : > { %s1668_s13 = scalar_lea.vmem (!%p242_p9), %s1667_s9, 8192 }
  0x13   : > { %1478 = vmatpush3.bf16.msra.mxu0 (!%p242_p9), %v1637_v1  ;;  %1594 = vmatpush3.bf16.msra.mxu1 (!%p242_p9), %v1637_v1 }
  0x14   : > { %1511 = vmatprep.subr.bf16.mxu1 (!%p242_p9), %v1654_v2  ;;  %1551 = vmatprep.subr.bf16.mxu0 (!%p242_p9), %v1658_v22 }
  0x15   : > { %s2138_s15 = smov (!%p274_p10, %s1332_s15), 63 }
  0x16   : > { %s1333_s20 = sshll.u32 %s2138_s15, 2  ;;  %s1331_s15 = sshll.u32 %s270_s14, 8 }
  0x17   : > { %s1830_s23 = scalar_lea.vmem %s2123_s0, %s1333_s20  ;;  %s2007_s18 = scalar_lea.vmem [#allocation2], %s1331_s15 }
  0x18   : > { %v1638_v3 = vld [vmem:[%s1830_s23] sm:$0xff]   ;;  %v1639_v4 = vld [vmem:[%s1830_s23 + $0x8] sm:$0xff]   ;;  %v1640_v5 = vld [vmem:[%s1830_s23 + $0x10] sm:$0xff]   ;;  %s1265_s20 = sshll.u32 %s2007_s18, 4  ;;  %s2074_s20 = int_to_ptr.vmem [resolvable:$true] %s1265_s20 }
  0x19   : > { %1479 = vmatprep.mubr.msk.bf16.mxu0 %vm416_vm0, %v1638_v3  ;;  %v1641_v6 = vld [vmem:[%s1830_s23 + $0x18] sm:$0xff]   ;;  %v1642_v7 = vld [vmem:[%s1830_s23 + $0x20] sm:$0xff]   ;;  %v1647_v10 = vld [vmem:[%s1830_s23 + $0x48] sm:$0xff]   ;;  %s1662_s29 = scalar_lea.vmem %s2074_s20, 4096  ;;  %p1669_p0 = scmp.lt.s32.totalorder %s2074_s20, %s1667_s9 }
  0x1a   : > { %1480 = vmatmul.mubr.msk.bf16.vlgmr.msra.gmra.mrb[0].mxu0 %vm416_vm0, %v1639_v4  ;;  %v1646_v8 = vld [vmem:[%s1830_s23 + $0x40] sm:$0xff]   ;;  %v1648_v11 = vld [vmem:[%s1830_s23 + $0x50] sm:$0xff]   ;;  %v1643_v13 = vld [vmem:[%s1830_s23 + $0x28] sm:$0xff]   ;;  %p1663_p11 = scmp.ne.s32.totalorder %s2074_s20, %s1662_s29  ;;  %p1670_p1 = scmp.lt.s32.totalorder %s1668_s13, %s1662_s29 }
  0x1b   : > { %1483 = vmatprep.mubr.msk.bf16.mxu0 %vm416_vm0, %v1640_v5  ;;  %1495 = vmatprep.mubr.msk.bf16.mxu1 %vm416_vm0, %v1646_v8  ;;  %v1644_v14 = vld [vmem:[%s1830_s23 + $0x30] sm:$0xff]   ;;  %v1649_v15 = vld [vmem:[%s1830_s23 + $0x58] sm:$0xff]   ;;  %v1650_v16 = vld [vmem:[%s1830_s23 + $0x60] sm:$0xff]  }
  0x1c   : > { %1496 = vmatmul.mubr.msk.bf16.vlgmr.msra.gmra.mrb[0].mxu1 %vm416_vm0, %v1647_v10  ;;  %v1645_v17 = vld [vmem:[%s1830_s23 + $0x38] sm:$0xff]   ;;  %v1651_v18 = vld [vmem:[%s1830_s23 + $0x68] sm:$0xff]   ;;  %v1652_v19 = vld [vmem:[%s1830_s23 + $0x70] sm:$0xff]   ;;  %1552 = vmatpush3.bf16.msra.mxu0 %v1658_v22  ;;  %p1664_p12 = pnand %p1663_p11, %p1807_p5  ;;  %p1671_p2 = por %p1670_p1, %p1669_p0 }
  0x1d   : > { %1499 = vmatprep.mubr.msk.bf16.mxu1 %vm416_vm0, %v1648_v11  ;;  %1512 = vmatpush3.bf16.msra.mxu1 %v1654_v2  ;;  %v1653_v20 = vld [vmem:[%s1830_s23 + $0x78] sm:$0xff]   ;;  %s2072_s23 = scalar_lea.hbm %s2130_s7, %s1416_s19 }
  0x1e   : > { %1513 = vmatprep.subr.bf16.mxu1 %v1655_v9  ;;  %1553 = vmatprep.subr.bf16.mxu0 %v1659_v23  ;;  %p1665_p13 = pneg %p1664_p12 }
  0x20   : > { %1554 = vmatpush3.bf16.msra.mxu0 %v1659_v23  ;;  %p1672_p3 = pnand %p1671_p2, %p1665_p13 }
  0x21   : > { %1514 = vmatpush3.bf16.msra.mxu1 %v1655_v9  ;;  %1555 = vmatprep.subr.bf16.mxu0 %v1660_v24 }
  0x22   : > { %1484 = vmatmul.mubr.msk.bf16.gmra.mrb[4].mxu0 %vm416_vm0, %v1641_v6  ;;  %1515 = vmatprep.subr.bf16.mxu1 %v1656_v12 }
  0x23   : > { %1487 = vmatprep.mubr.msk.bf16.mxu0 %vm416_vm0, %v1642_v7 }
  0x24   : > { %1500 = vmatmul.mubr.msk.bf16.gmra.mrb[4].mxu1 %vm416_vm0, %v1649_v15  ;;  %1556 = vmatpush3.bf16.msra.mxu0 %v1660_v24 }
  0x25   : > { %1503 = vmatprep.mubr.msk.bf16.mxu1 %vm416_vm0, %v1650_v16  ;;  %1516 = vmatpush3.bf16.msra.mxu1 %v1656_v12 }
  0x26   : > { %1517 = vmatprep.subr.bf16.mxu1 %v1657_v21 }
  0x29   : > { %1518 = vmatpush3.bf16.msra.mxu1 %v1657_v21 }
  0x2a   : > { %1488 = vmatmul.mubr.msk.bf16.gmra.mrb[8].mxu0 %vm416_vm0, %v1643_v13 }
  0x2b   : > { %1491 = vmatprep.mubr.msk.bf16.mxu0 %vm416_vm0, %v1644_v14 }
  0x2c   : > { %1504 = vmatmul.mubr.msk.bf16.gmra.mrb[8].mxu1 %vm416_vm0, %v1651_v18 }
  0x2d   : > { %1507 = vmatprep.mubr.msk.bf16.mxu1 %vm416_vm0, %v1652_v19 }
  0x32   : > { %1492 = vmatmul.mubr.msk.bf16.gmra.mrb[12].mxu0 %vm416_vm0, %v1645_v17 }
  0x34   : > { %1508 = vmatmul.mubr.msk.bf16.gmra.mrb[12].mxu1 %vm416_vm0, %v1653_v20 }
  0xed   : > { %v1481_v26 = vpop.f32.mrb[0].mxu0 }
  0xee   : > { %v508_v27 = vadd.f32 %v1481_v26, %v1885_v25  ;;  %v499_v28 = vpop.f32.mrb[1].mxu0 }
  0xef   : > { %v500_v29 = vadd.f32 %v1885_v25, %v499_v28  ;;  %v1482_v30 = vpop.f32.mrb[2].mxu0  ;;  %v1497_v41 = vpop.f32.mrb[0].mxu1 }
  0xf0   : > { %v511_v31 = vadd.f32 %v1482_v30, %v1885_v25  ;;  %v502_v32 = vpop.f32.mrb[3].mxu0  ;;  %v628_v34 = vmax.f32 %v508_v27, 0.0  ;;  %v572_v44 = vadd.f32 %v1497_v41, %v1885_v25  ;;  %v563_v45 = vpop.f32.mrb[1].mxu1 }
  0xf1   : > { %v503_v33 = vadd.f32 %v1885_v25, %v502_v32  ;;  %v626_v36 = vmax.f32 %v500_v29, 0.0  ;;  %v564_v48 = vadd.f32 %v1885_v25, %v563_v45  ;;  %v1498_v49 = vpop.f32.mrb[2].mxu1 }
  0xf2   : > { %v629_v35 = vmax.f32 %v511_v31, 0.0  ;;  %v644_v52 = vmax.f32 %v572_v44, 0.0  ;;  %v575_v53 = vadd.f32 %v1498_v49, %v1885_v25  ;;  %v566_v54 = vpop.f32.mrb[3].mxu1 }
  0xf3   : > { %v627_v37 = vmax.f32 %v503_v33, 0.0  ;;  %v642_v56 = vmax.f32 %v564_v48, 0.0  ;;  %v567_v57 = vadd.f32 %v1885_v25, %v566_v54 }
  0xf4   : > { %v659_v38 = vpack.c.bf16 %v629_v35, %v628_v34  ;;  %v645_v60 = vmax.f32 %v575_v53, 0.0 }
  0xf5   : > { %v658_v39 = vpack.c.bf16 %v627_v37, %v626_v36  ;;  %v1485_v40 = vpop.f32.mrb[4].mxu0  ;;  %v643_v63 = vmax.f32 %v567_v57, 0.0 }
  0xf6   : > { %v524_v42 = vadd.f32 %v1485_v40, %v1885_v25  ;;  %v515_v43 = vpop.f32.mrb[5].mxu0  ;;  %v1901_v1 = vpack.c.bf16 %v645_v60, %v644_v52 }
  0xf7   : > { %v516_v46 = vadd.f32 %v1885_v25, %v515_v43  ;;  %v1486_v47 = vpop.f32.mrb[6].mxu0  ;;  %1519 = vmatprep.mubr.msk.bf16.mxu1 %vm713_vm1, %v658_v39  ;;  %v1903_v4 = vpack.c.bf16 %v643_v63, %v642_v56  ;;  %v1501_v5 = vpop.f32.mrb[4].mxu1 }
  0xf8   : > { %v527_v50 = vadd.f32 %v1486_v47, %v1885_v25  ;;  %v518_v51 = vpop.f32.mrb[7].mxu0  ;;  %1520 = vmatmul.mubr.msk.bf16.vlgmr.msra.gmra.mrb[16].mxu1 %vm713_vm1, %v659_v38  ;;  %v632_v58 = vmax.f32 %v524_v42, 0.0  ;;  %v588_v8 = vadd.f32 %v1501_v5, %v1885_v25  ;;  %v579_v9 = vpop.f32.mrb[5].mxu1 }
  0xf9   : > { %v519_v55 = vadd.f32 %v1885_v25, %v518_v51  ;;  %v630_v61 = vmax.f32 %v516_v46, 0.0  ;;  %v580_v12 = vadd.f32 %v1885_v25, %v579_v9  ;;  %v1502_v13 = vpop.f32.mrb[6].mxu1 }
  0xfa   : > { %v633_v59 = vmax.f32 %v527_v50, 0.0  ;;  %v648_v16 = vmax.f32 %v588_v8, 0.0  ;;  %v591_v17 = vadd.f32 %v1502_v13, %v1885_v25  ;;  %v582_v18 = vpop.f32.mrb[7].mxu1 }
  0xfb   : > { %v631_v62 = vmax.f32 %v519_v55, 0.0  ;;  %v646_v20 = vmax.f32 %v580_v12, 0.0  ;;  %v583_v21 = vadd.f32 %v1885_v25, %v582_v18 }
  0xfc   : > { %v661_v0 = vpack.c.bf16 %v633_v59, %v632_v58  ;;  %v649_v24 = vmax.f32 %v591_v17, 0.0 }
  0xfd   : > { %v660_v2 = vpack.c.bf16 %v631_v62, %v630_v61  ;;  %v1489_v3 = vpop.f32.mrb[8].mxu0  ;;  %v647_v28 = vmax.f32 %v583_v21, 0.0 }
  0xfe   : > { %v540_v6 = vadd.f32 %v1489_v3, %v1885_v25  ;;  %v531_v7 = vpop.f32.mrb[9].mxu0  ;;  %v669_v30 = vpack.c.bf16 %v649_v24, %v648_v16 }
  0xff   : > { %v532_v10 = vadd.f32 %v1885_v25, %v531_v7  ;;  %v1490_v11 = vpop.f32.mrb[10].mxu0  ;;  %1523 = vmatprep.mubr.msk.bf16.mxu1 %vm713_vm1, %v660_v2  ;;  %v668_v33 = vpack.c.bf16 %v647_v28, %v646_v20  ;;  %v1505_v34 = vpop.f32.mrb[8].mxu1 }
 0x100   : > { %v543_v14 = vadd.f32 %v1490_v11, %v1885_v25  ;;  %v534_v15 = vpop.f32.mrb[11].mxu0  ;;  %1524 = vmatmul.mubr.msk.bf16.gmra.mrb[20].mxu1 %vm713_vm1, %v661_v0  ;;  %v636_v22 = vmax.f32 %v540_v6, 0.0  ;;  %v604_v37 = vadd.f32 %v1505_v34, %v1885_v25  ;;  %v595_v38 = vpop.f32.mrb[9].mxu1 }
 0x101   : > { %v535_v19 = vadd.f32 %v1885_v25, %v534_v15  ;;  %v634_v26 = vmax.f32 %v532_v10, 0.0  ;;  %v596_v41 = vadd.f32 %v1885_v25, %v595_v38  ;;  %v1506_v42 = vpop.f32.mrb[10].mxu1 }
 0x102   : > { %v637_v23 = vmax.f32 %v543_v14, 0.0  ;;  %v652_v45 = vmax.f32 %v604_v37, 0.0  ;;  %v607_v46 = vadd.f32 %v1506_v42, %v1885_v25  ;;  %v598_v47 = vpop.f32.mrb[11].mxu1 }
 0x103   : > { %v635_v27 = vmax.f32 %v535_v19, 0.0  ;;  %v650_v49 = vmax.f32 %v596_v41, 0.0  ;;  %v599_v50 = vadd.f32 %v1885_v25, %v598_v47 }
 0x104   : > { %v663_v29 = vpack.c.bf16 %v637_v23, %v636_v22  ;;  %v653_v53 = vmax.f32 %v607_v46, 0.0 }
 0x105   : > { %v662_v31 = vpack.c.bf16 %v635_v27, %v634_v26  ;;  %v1493_v32 = vpop.f32.mrb[12].mxu0  ;;  %v651_v56 = vmax.f32 %v599_v50, 0.0 }
 0x106   : > { %v556_v35 = vadd.f32 %v1493_v32, %v1885_v25  ;;  %v547_v36 = vpop.f32.mrb[13].mxu0  ;;  %v671_v58 = vpack.c.bf16 %v653_v53, %v652_v45 }
 0x107   : > { %v548_v39 = vadd.f32 %v1885_v25, %v547_v36  ;;  %v1494_v40 = vpop.f32.mrb[14].mxu0  ;;  %1527 = vmatprep.mubr.msk.bf16.mxu1 %vm713_vm1, %v662_v31  ;;  %v670_v60 = vpack.c.bf16 %v651_v56, %v650_v49  ;;  %v1509_v61 = vpop.f32.mrb[12].mxu1 }
 0x108   : > { %v559_v43 = vadd.f32 %v1494_v40, %v1885_v25  ;;  %v550_v44 = vpop.f32.mrb[15].mxu0  ;;  %1528 = vmatmul.mubr.msk.bf16.gmra.mrb[24].mxu1 %vm713_vm1, %v663_v29  ;;  %v640_v51 = vmax.f32 %v556_v35, 0.0  ;;  %v620_v62 = vadd.f32 %v1509_v61, %v1885_v25  ;;  %v611_v63 = vpop.f32.mrb[13].mxu1 }
 0x109   : > { %v551_v48 = vadd.f32 %v1885_v25, %v550_v44  ;;  %v638_v54 = vmax.f32 %v548_v39, 0.0  ;;  %v612_v0 = vadd.f32 %v1885_v25, %v611_v63  ;;  %v1510_v2 = vpop.f32.mrb[14].mxu1 }
 0x10a   : > { %v641_v52 = vmax.f32 %v559_v43, 0.0  ;;  %v656_v3 = vmax.f32 %v620_v62, 0.0  ;;  %v623_v5 = vadd.f32 %v1510_v2, %v1885_v25  ;;  %v614_v6 = vpop.f32.mrb[15].mxu1 }
 0x10b   : > { %v639_v55 = vmax.f32 %v551_v48, 0.0  ;;  %v654_v7 = vmax.f32 %v612_v0, 0.0  ;;  %v615_v8 = vadd.f32 %v1885_v25, %v614_v6  ;;  %v1661_v25 = vld [vmem:[%s2128_s5 + $0x18] sm:$0xff]  }
 0x10c   : > { %v665_v57 = vpack.c.bf16 %v641_v52, %v640_v51  ;;  %v657_v9 = vmax.f32 %v623_v5, 0.0  ;;  %1557 = vmatprep.subr.bf16.mxu0 %v1661_v25 }
 0x10d   : > { %v664_v59 = vpack.c.bf16 %v639_v55, %v638_v54  ;;  %v655_v10 = vmax.f32 %v615_v8, 0.0  ;;  %1558 = vmatpush3.bf16.msra.mxu0 %v1661_v25 }
 0x10e   : > { %v673_v11 = vpack.c.bf16 %v657_v9, %v656_v3 }
 0x10f   : > { %1531 = vmatprep.mubr.msk.bf16.mxu1 %vm713_vm1, %v664_v59  ;;  %v672_v12 = vpack.c.bf16 %v655_v10, %v654_v7 }
 0x110   : > { %1532 = vmatmul.mubr.msk.bf16.gmra.mrb[28].mxu1 %vm713_vm1, %v665_v57 }
 0x111   : > { %1535 = vmatprep.mubr.msk.bf16.mxu1 %vm713_vm1, %v1903_v4 }
 0x118   : > { %1536 = vmatmul.mubr.msk.bf16.gmra.mrb[32].mxu1 %vm713_vm1, %v1901_v1  ;;  %v1947_v1 = vld [vmem:[%s2127_s4] ss:$0 sm:$0xff] }
 0x119   : > { %1539 = vmatprep.mubr.msk.bf16.mxu1 %vm713_vm1, %v668_v33 }
 0x120   : > { %1540 = vmatmul.mubr.msk.bf16.gmra.mrb[36].mxu1 %vm713_vm1, %v669_v30 }
 0x121   : > { %1543 = vmatprep.mubr.msk.bf16.mxu1 %vm713_vm1, %v670_v60 }
 0x128   : > { %1544 = vmatmul.mubr.msk.bf16.gmra.mrb[40].mxu1 %vm713_vm1, %v671_v58 }
 0x129   : > { %1547 = vmatprep.mubr.msk.bf16.mxu1 %vm713_vm1, %v672_v12 }
 0x130   : > { %1548 = vmatmul.mubr.msk.bf16.gmra.mrb[44].mxu1 %vm713_vm1, %v673_v11 }
 0x1cb   : > { %v1521_v4 = vpop.f32.mrb[16].mxu1 }
 0x1cc   : > { %v805_v13 = vadd.f32 %v1521_v4, %v1947_v1  ;;  %v796_v14 = vpop.f32.mrb[17].mxu1 }
 0x1cd   : > { %v797_v15 = vadd.f32 %v1947_v1, %v796_v14  ;;  %v1522_v16 = vpop.f32.mrb[18].mxu1 }
 0x1ce   : > { %v808_v17 = vadd.f32 %v1522_v16, %v1947_v1  ;;  %v799_v18 = vpop.f32.mrb[19].mxu1  ;;  %v925_v20 = vmax.f32 %v805_v13, 0.0 }
 0x1cf   : > { %v800_v19 = vadd.f32 %v1947_v1, %v799_v18  ;;  %v923_v22 = vmax.f32 %v797_v15, 0.0 }
 0x1d0   : > { %v926_v21 = vmax.f32 %v808_v17, 0.0 }
 0x1d1   : > { %v924_v23 = vmax.f32 %v800_v19, 0.0 }
 0x1d2   : > { %v956_v24 = vpack.c.bf16 %v926_v21, %v925_v20 }
 0x1d3   : > { %v955_v26 = vpack.c.bf16 %v924_v23, %v923_v22  ;;  %v1525_v27 = vpop.f32.mrb[20].mxu1 }
 0x1d4   : > { %v821_v28 = vadd.f32 %v1525_v27, %v1947_v1  ;;  %v812_v29 = vpop.f32.mrb[21].mxu1 }
 0x1d5   : > { %v813_v30 = vadd.f32 %v1947_v1, %v812_v29  ;;  %v1526_v31 = vpop.f32.mrb[22].mxu1  ;;  %1559 = vmatprep.mubr.msk.bf16.mxu0 %vm713_vm1, %v955_v26 }
 0x1d6   : > { %v824_v32 = vadd.f32 %v1526_v31, %v1947_v1  ;;  %v815_v33 = vpop.f32.mrb[23].mxu1  ;;  %1560 = vmatmul.mubr.msk.bf16.vlgmr.msra.gmra.mrb[16].mxu0 %vm713_vm1, %v956_v24  ;;  %v929_v35 = vmax.f32 %v821_v28, 0.0 }
 0x1d7   : > { %v816_v34 = vadd.f32 %v1947_v1, %v815_v33  ;;  %v927_v37 = vmax.f32 %v813_v30, 0.0 }
 0x1d8   : > { %v930_v36 = vmax.f32 %v824_v32, 0.0 }
 0x1d9   : > { %v928_v38 = vmax.f32 %v816_v34, 0.0 }
 0x1da   : > { %v958_v39 = vpack.c.bf16 %v930_v36, %v929_v35 }
 0x1db   : > { %v957_v40 = vpack.c.bf16 %v928_v38, %v927_v37  ;;  %v1529_v41 = vpop.f32.mrb[24].mxu1 }
 0x1dc   : > { %v837_v42 = vadd.f32 %v1529_v41, %v1947_v1  ;;  %v828_v43 = vpop.f32.mrb[25].mxu1 }
 0x1dd   : > { %v829_v44 = vadd.f32 %v1947_v1, %v828_v43  ;;  %v1530_v45 = vpop.f32.mrb[26].mxu1  ;;  %1563 = vmatprep.mubr.msk.bf16.mxu0 %vm713_vm1, %v957_v40 }
 0x1de   : > { %v840_v46 = vadd.f32 %v1530_v45, %v1947_v1  ;;  %v831_v47 = vpop.f32.mrb[27].mxu1  ;;  %1564 = vmatmul.mubr.msk.bf16.gmra.mrb[20].mxu0 %vm713_vm1, %v958_v39  ;;  %v933_v49 = vmax.f32 %v837_v42, 0.0 }
 0x1df   : > { %v832_v48 = vadd.f32 %v1947_v1, %v831_v47  ;;  %v931_v51 = vmax.f32 %v829_v44, 0.0 }
 0x1e0   : > { %v934_v50 = vmax.f32 %v840_v46, 0.0 }
 0x1e1   : > { %v932_v52 = vmax.f32 %v832_v48, 0.0 }
 0x1e2   : > { %v960_v53 = vpack.c.bf16 %v934_v50, %v933_v49 }
 0x1e3   : > { %v959_v54 = vpack.c.bf16 %v932_v52, %v931_v51  ;;  %v1533_v55 = vpop.f32.mrb[28].mxu1 }
 0x1e4   : > { %v853_v56 = vadd.f32 %v1533_v55, %v1947_v1  ;;  %v844_v57 = vpop.f32.mrb[29].mxu1 }
 0x1e5   : > { %v845_v58 = vadd.f32 %v1947_v1, %v844_v57  ;;  %v1534_v59 = vpop.f32.mrb[30].mxu1  ;;  %1567 = vmatprep.mubr.msk.bf16.mxu0 %vm713_vm1, %v959_v54 }
 0x1e6   : > { %v856_v60 = vadd.f32 %v1534_v59, %v1947_v1  ;;  %v847_v61 = vpop.f32.mrb[31].mxu1  ;;  %1568 = vmatmul.mubr.msk.bf16.gmra.mrb[24].mxu0 %vm713_vm1, %v960_v53  ;;  %v937_v63 = vmax.f32 %v853_v56, 0.0 }
 0x1e7   : > { %v848_v62 = vadd.f32 %v1947_v1, %v847_v61  ;;  %v935_v2 = vmax.f32 %v845_v58, 0.0 }
 0x1e8   : > { %v938_v0 = vmax.f32 %v856_v60, 0.0 }
 0x1e9   : > { %v936_v3 = vmax.f32 %v848_v62, 0.0  ;;  %v2003_v62 = vld [vmem:[%s2129_s6] ss:$0 sm:$0xff] }
 0x1ea   : > { %v962_v5 = vpack.c.bf16 %v938_v0, %v937_v63 }
 0x1eb   : > { %v961_v6 = vpack.c.bf16 %v936_v3, %v935_v2  ;;  %v1537_v7 = vpop.f32.mrb[32].mxu1 }
 0x1ec   : > { %v869_v8 = vadd.f32 %v1537_v7, %v1947_v1  ;;  %v860_v9 = vpop.f32.mrb[33].mxu1 }
 0x1ed   : > { %v861_v10 = vadd.f32 %v1947_v1, %v860_v9  ;;  %v1538_v11 = vpop.f32.mrb[34].mxu1  ;;  %1571 = vmatprep.mubr.msk.bf16.mxu0 %vm713_vm1, %v961_v6 }
 0x1ee   : > { %v872_v12 = vadd.f32 %v1538_v11, %v1947_v1  ;;  %v863_v25 = vpop.f32.mrb[35].mxu1  ;;  %1572 = vmatmul.mubr.msk.bf16.gmra.mrb[28].mxu0 %vm713_vm1, %v962_v5  ;;  %v941_v13 = vmax.f32 %v869_v8, 0.0 }
 0x1ef   : > { %v864_v4 = vadd.f32 %v1947_v1, %v863_v25  ;;  %v939_v15 = vmax.f32 %v861_v10, 0.0 }
 0x1f0   : > { %v942_v14 = vmax.f32 %v872_v12, 0.0 }
 0x1f1   : > { %v940_v16 = vmax.f32 %v864_v4, 0.0 }
 0x1f2   : > { %v964_v17 = vpack.c.bf16 %v942_v14, %v941_v13 }
 0x1f3   : > { %v963_v18 = vpack.c.bf16 %v940_v16, %v939_v15  ;;  %v1541_v19 = vpop.f32.mrb[36].mxu1 }
 0x1f4   : > { %v885_v20 = vadd.f32 %v1541_v19, %v1947_v1  ;;  %v876_v21 = vpop.f32.mrb[37].mxu1 }
 0x1f5   : > { %v877_v22 = vadd.f32 %v1947_v1, %v876_v21  ;;  %v1542_v23 = vpop.f32.mrb[38].mxu1  ;;  %1575 = vmatprep.mubr.msk.bf16.mxu0 %vm713_vm1, %v963_v18 }
 0x1f6   : > { %v888_v24 = vadd.f32 %v1542_v23, %v1947_v1  ;;  %v879_v26 = vpop.f32.mrb[39].mxu1  ;;  %1576 = vmatmul.mubr.msk.bf16.gmra.mrb[32].mxu0 %vm713_vm1, %v964_v17  ;;  %v945_v28 = vmax.f32 %v885_v20, 0.0 }
 0x1f7   : > { %v880_v27 = vadd.f32 %v1947_v1, %v879_v26  ;;  %v943_v30 = vmax.f32 %v877_v22, 0.0 }
 0x1f8   : > { %v946_v29 = vmax.f32 %v888_v24, 0.0 }
 0x1f9   : > { %v944_v31 = vmax.f32 %v880_v27, 0.0 }
 0x1fa   : > { %v966_v32 = vpack.c.bf16 %v946_v29, %v945_v28 }
 0x1fb   : > { %v965_v33 = vpack.c.bf16 %v944_v31, %v943_v30  ;;  %v1545_v34 = vpop.f32.mrb[40].mxu1 }
 0x1fc   : > { %v901_v35 = vadd.f32 %v1545_v34, %v1947_v1  ;;  %v892_v36 = vpop.f32.mrb[41].mxu1 }
 0x1fd   : > { %v893_v37 = vadd.f32 %v1947_v1, %v892_v36  ;;  %v1546_v38 = vpop.f32.mrb[42].mxu1  ;;  %1579 = vmatprep.mubr.msk.bf16.mxu0 %vm713_vm1, %v965_v33 }
 0x1fe   : > { %v904_v39 = vadd.f32 %v1546_v38, %v1947_v1  ;;  %v895_v40 = vpop.f32.mrb[43].mxu1  ;;  %1580 = vmatmul.mubr.msk.bf16.gmra.mrb[36].mxu0 %vm713_vm1, %v966_v32  ;;  %v949_v42 = vmax.f32 %v901_v35, 0.0 }
 0x1ff   : > { %v896_v41 = vadd.f32 %v1947_v1, %v895_v40  ;;  %v947_v44 = vmax.f32 %v893_v37, 0.0 }
 0x200   : > { %v950_v43 = vmax.f32 %v904_v39, 0.0 }
 0x201   : > { %v948_v45 = vmax.f32 %v896_v41, 0.0 }
 0x202   : > { %v968_v46 = vpack.c.bf16 %v950_v43, %v949_v42 }
 0x203   : > { %v967_v47 = vpack.c.bf16 %v948_v45, %v947_v44  ;;  %v1549_v48 = vpop.f32.mrb[44].mxu1 }
 0x204   : > { %v917_v49 = vadd.f32 %v1549_v48, %v1947_v1  ;;  %v908_v50 = vpop.f32.mrb[45].mxu1 }
 0x205   : > { %v909_v51 = vadd.f32 %v1947_v1, %v908_v50  ;;  %v1550_v52 = vpop.f32.mrb[46].mxu1  ;;  %1583 = vmatprep.mubr.msk.bf16.mxu0 %vm713_vm1, %v967_v47 }
 0x206   : > { %v920_v53 = vadd.f32 %v1550_v52, %v1947_v1  ;;  %v911_v54 = vpop.f32.mrb[47].mxu1  ;;  %1584 = vmatmul.mubr.msk.bf16.gmra.mrb[40].mxu0 %vm713_vm1, %v968_v46  ;;  %v953_v56 = vmax.f32 %v917_v49, 0.0 }
 0x207   : > { %v912_v55 = vadd.f32 %v1947_v1, %v911_v54  ;;  %v951_v58 = vmax.f32 %v909_v51, 0.0 }
 0x208   : > { %v954_v57 = vmax.f32 %v920_v53, 0.0 }
 0x209   : > { %v952_v59 = vmax.f32 %v912_v55, 0.0 }
 0x20a   : > { %v970_v60 = vpack.c.bf16 %v954_v57, %v953_v56 }
 0x20b   : > { %v969_v61 = vpack.c.bf16 %v952_v59, %v951_v58 }
 0x20d   : > { %1587 = vmatprep.mubr.msk.bf16.mxu0 %vm713_vm1, %v969_v61 }
 0x20e   : > { %1588 = vmatmul.mubr.msk.bf16.gmra.mrb[44].mxu0 %vm713_vm1, %v970_v60 }
 0x2a9   : > { %v1561_v63 = vpop.f32.mrb[16].mxu0 }
 0x2aa   : > { %v1101_v1 = vadd.f32 %v1561_v63, %v2003_v62  ;;  %v1092_v0 = vpop.f32.mrb[17].mxu0 }
 0x2ab   : > { %v1093_v2 = vadd.f32 %v2003_v62, %v1092_v0  ;;  %v1562_v3 = vpop.f32.mrb[18].mxu0 }
 0x2ac   : > { %1221 = vst [vmem:[%s2007_s18 + $0x10] sm:$0xff] %v1101_v1  ;;  %v1104_v5 = vadd.f32 %v1562_v3, %v2003_v62  ;;  %v1095_v6 = vpop.f32.mrb[19].mxu0 }
 0x2ad   : > { %1219 = vst [vmem:[%s2007_s18] sm:$0xff] %v1093_v2  ;;  %v1096_v7 = vadd.f32 %v2003_v62, %v1095_v6 }
 0x2ae   : > { %1222 = vst [vmem:[%s2007_s18 + $0x18] sm:$0xff] %v1104_v5 }
 0x2af   : > { %1220 = vst [vmem:[%s2007_s18 + $0x8] sm:$0xff] %v1096_v7 }
 0x2b1   : > { %v1565_v8 = vpop.f32.mrb[20].mxu0 }
 0x2b2   : > { %v1117_v9 = vadd.f32 %v1565_v8, %v2003_v62  ;;  %v1108_v10 = vpop.f32.mrb[21].mxu0 }
 0x2b3   : > { %v1109_v11 = vadd.f32 %v2003_v62, %v1108_v10  ;;  %v1566_v12 = vpop.f32.mrb[22].mxu0 }
 0x2b4   : > { %1225 = vst [vmem:[%s2007_s18 + $0x30] sm:$0xff] %v1117_v9  ;;  %v1120_v25 = vadd.f32 %v1566_v12, %v2003_v62  ;;  %v1111_v4 = vpop.f32.mrb[23].mxu0 }
 0x2b5   : > { %1223 = vst [vmem:[%s2007_s18 + $0x20] sm:$0xff] %v1109_v11  ;;  %v1112_v13 = vadd.f32 %v2003_v62, %v1111_v4 }
 0x2b6   : > { %1226 = vst [vmem:[%s2007_s18 + $0x38] sm:$0xff] %v1120_v25 }
 0x2b7   : > { %1224 = vst [vmem:[%s2007_s18 + $0x28] sm:$0xff] %v1112_v13 }
 0x2b9   : > { %v1569_v14 = vpop.f32.mrb[24].mxu0 }
 0x2ba   : > { %v1133_v15 = vadd.f32 %v1569_v14, %v2003_v62  ;;  %v1124_v16 = vpop.f32.mrb[25].mxu0 }
 0x2bb   : > { %v1125_v17 = vadd.f32 %v2003_v62, %v1124_v16  ;;  %v1570_v18 = vpop.f32.mrb[26].mxu0 }
 0x2bc   : > { %1229 = vst [vmem:[%s2007_s18 + $0x50] sm:$0xff] %v1133_v15  ;;  %v1136_v19 = vadd.f32 %v1570_v18, %v2003_v62  ;;  %v1127_v20 = vpop.f32.mrb[27].mxu0 }
 0x2bd   : > { %1227 = vst [vmem:[%s2007_s18 + $0x40] sm:$0xff] %v1125_v17  ;;  %v1128_v21 = vadd.f32 %v2003_v62, %v1127_v20 }
 0x2be   : > { %1230 = vst [vmem:[%s2007_s18 + $0x58] sm:$0xff] %v1136_v19 }
 0x2bf   : > { %1228 = vst [vmem:[%s2007_s18 + $0x48] sm:$0xff] %v1128_v21 }
 0x2c1   : > { %v1573_v22 = vpop.f32.mrb[28].mxu0 }
 0x2c2   : > { %v1149_v23 = vadd.f32 %v1573_v22, %v2003_v62  ;;  %v1140_v24 = vpop.f32.mrb[29].mxu0 }
 0x2c3   : > { %v1141_v26 = vadd.f32 %v2003_v62, %v1140_v24  ;;  %v1574_v27 = vpop.f32.mrb[30].mxu0 }
 0x2c4   : > { %1233 = vst [vmem:[%s2007_s18 + $0x70] sm:$0xff] %v1149_v23  ;;  %v1152_v28 = vadd.f32 %v1574_v27, %v2003_v62  ;;  %v1143_v29 = vpop.f32.mrb[31].mxu0 }
 0x2c5   : > { %1231 = vst [vmem:[%s2007_s18 + $0x60] sm:$0xff] %v1141_v26  ;;  %v1144_v30 = vadd.f32 %v2003_v62, %v1143_v29 }
 0x2c6   : > { %1234 = vst [vmem:[%s2007_s18 + $0x78] sm:$0xff] %v1152_v28 }
 0x2c7   : > { %1232 = vst [vmem:[%s2007_s18 + $0x68] sm:$0xff] %v1144_v30 }
 0x2c9   : > { %v1577_v31 = vpop.f32.mrb[32].mxu0 }
 0x2ca   : > { %v1165_v32 = vadd.f32 %v1577_v31, %v2003_v62  ;;  %v1156_v33 = vpop.f32.mrb[33].mxu0 }
 0x2cb   : > { %v1157_v34 = vadd.f32 %v2003_v62, %v1156_v33  ;;  %v1578_v35 = vpop.f32.mrb[34].mxu0 }
 0x2cc   : > { %1237 = vst [vmem:[%s2007_s18 + $0x90] sm:$0xff] %v1165_v32  ;;  %v1168_v36 = vadd.f32 %v1578_v35, %v2003_v62  ;;  %v1159_v37 = vpop.f32.mrb[35].mxu0 }
 0x2cd   : > { %1235 = vst [vmem:[%s2007_s18 + $0x80] sm:$0xff] %v1157_v34  ;;  %v1160_v38 = vadd.f32 %v2003_v62, %v1159_v37 }
 0x2ce   : > { %1238 = vst [vmem:[%s2007_s18 + $0x98] sm:$0xff] %v1168_v36 }
 0x2cf   : > { %1236 = vst [vmem:[%s2007_s18 + $0x88] sm:$0xff] %v1160_v38 }
 0x2d1   : > { %v1581_v39 = vpop.f32.mrb[36].mxu0 }
 0x2d2   : > { %v1181_v40 = vadd.f32 %v1581_v39, %v2003_v62  ;;  %v1172_v41 = vpop.f32.mrb[37].mxu0 }
 0x2d3   : > { %v1173_v42 = vadd.f32 %v2003_v62, %v1172_v41  ;;  %v1582_v43 = vpop.f32.mrb[38].mxu0 }
 0x2d4   : > { %1241 = vst [vmem:[%s2007_s18 + $0xb0] sm:$0xff] %v1181_v40  ;;  %v1184_v44 = vadd.f32 %v1582_v43, %v2003_v62  ;;  %v1175_v45 = vpop.f32.mrb[39].mxu0 }
 0x2d5   : > { %1239 = vst [vmem:[%s2007_s18 + $0xa0] sm:$0xff] %v1173_v42  ;;  %v1176_v46 = vadd.f32 %v2003_v62, %v1175_v45 }
 0x2d6   : > { %1242 = vst [vmem:[%s2007_s18 + $0xb8] sm:$0xff] %v1184_v44 }
 0x2d7   : > { %1240 = vst [vmem:[%s2007_s18 + $0xa8] sm:$0xff] %v1176_v46 }
 0x2d9   : > { %v1585_v47 = vpop.f32.mrb[40].mxu0 }
 0x2da   : > { %v1197_v48 = vadd.f32 %v1585_v47, %v2003_v62  ;;  %v1188_v49 = vpop.f32.mrb[41].mxu0 }
 0x2db   : > { %v1189_v50 = vadd.f32 %v2003_v62, %v1188_v49  ;;  %v1586_v51 = vpop.f32.mrb[42].mxu0 }
 0x2dc   : > { %1245 = vst [vmem:[%s2007_s18 + $0xd0] sm:$0xff] %v1197_v48  ;;  %v1200_v52 = vadd.f32 %v1586_v51, %v2003_v62  ;;  %v1191_v53 = vpop.f32.mrb[43].mxu0 }
 0x2dd   : > { %1243 = vst [vmem:[%s2007_s18 + $0xc0] sm:$0xff] %v1189_v50  ;;  %v1192_v54 = vadd.f32 %v2003_v62, %v1191_v53 }
 0x2de   : > { %1246 = vst [vmem:[%s2007_s18 + $0xd8] sm:$0xff] %v1200_v52 }
 0x2df   : > { %1244 = vst [vmem:[%s2007_s18 + $0xc8] sm:$0xff] %v1192_v54 }
 0x2e1   : > { %v1589_v55 = vpop.f32.mrb[44].mxu0 }
 0x2e2   : > { %v1213_v56 = vadd.f32 %v1589_v55, %v2003_v62  ;;  %v1204_v57 = vpop.f32.mrb[45].mxu0 }
 0x2e3   : > { %v1205_v58 = vadd.f32 %v2003_v62, %v1204_v57  ;;  %v1590_v59 = vpop.f32.mrb[46].mxu0 }
 0x2e4   : > { %1249 = vst [vmem:[%s2007_s18 + $0xf0] sm:$0xff] %v1213_v56  ;;  %v1216_v60 = vadd.f32 %v1590_v59, %v2003_v62  ;;  %v1207_v61 = vpop.f32.mrb[47].mxu0 }
 0x2e5   : > { %1247 = vst [vmem:[%s2007_s18 + $0xe0] sm:$0xff] %v1205_v58  ;;  %v1208_v63 = vadd.f32 %v2003_v62, %v1207_v61 }
 0x2e6   : > { %1250 = vst [vmem:[%s2007_s18 + $0xf8] sm:$0xff] %v1216_v60 }
 0x2e7   : > { %1248 = vst [vmem:[%s2007_s18 + $0xe8] sm:$0xff] %v1208_v63 }
 0x2e8   : > { %1675 = shalt.err (!%p1672_p3)
}
 0x2e9   : > { %s1676_s14 = scalar_lea.hbm %s2072_s23, 4096  ;;  %s1680_s17 = scalar_lea.hbm %s2130_s7, 8192 }
 0x2ea   : > { %p1677_p4 = scmp.ne.s32.totalorder %s2072_s23, %s1676_s14  ;;  %p1681_p9 = scmp.lt.u32.totalorder %s2072_s23, %s2130_s7 }
 0x2eb   : > { %p1682_p10 = scmp.lt.u32.totalorder %s1680_s17, %s1676_s14  ;;  %p1684_p12 = scmp.lt.u32.totalorder %s1676_s14, %s2072_s23 }
 0x2ec   : > { %p1678_p7 = pnand %p1677_p4, %p1807_p5 }
 0x2ed   : > { %p1683_p11 = por %p1682_p10, %p1681_p9 }
 0x2ee   : > { %p1679_p8 = pneg %p1678_p7 }
 0x2ef   : > { %p1685_p13 = por %p1684_p12, %p1683_p11 }
 0x2f1   : > { %p1686_p0 = pnand %p1685_p13, %p1679_p8 }
 0x2f3   : > { %1689 = shalt.err (!%p1686_p0)
}
 0x2f4   : > { %s1727_s21 = smov 128   ;;  %s1728_s22 = smov 8  }
 0x2f5   : > { %1595 = dma.vmem_to_hbm [thread:$0]  (%p1807_p5), %s2074_s20, 4096, %s2072_s23, %s2082_s28, %s1727_s21, %s1727_s21, %s1728_s22  }
 0x2f6 PF: > { %p1601_p1 = scmp.ge.s32.totalorder %s1724_s27, 2  ;;  %s1280_s29 = sand.u32 1, %s1712_s24  }
 0x2f7   : > { %s1281_s8 = scalar_lea.sflag [#allocation3], %s1280_s29 }
 0x2f8   : > { %p1598_p2 = pnand %p1601_p1, %p1811_p6 }
 0x2fa   : > { %1707 = dma.done.wait (!%p1598_p2), %s1281_s8, 4096  }
 0x2fb   : > { %1709 = vsyncadd (!%p1598_p2), %s1281_s8, 4294963200  ;;  %p17_p3 = scmp.ge.s32.totalorder %s1794_s30, 4   ;;  %s2133_s24 = smov %s1716_s25 }
 0x2fc   : > { %s2134_s25 = smov %s1720_s26  ;;  %s2135_s26 = smov %s1805_s10 }
 0x2fd   : > { %s2136_s27 = smov %s1794_s30  ;;  %19 = sbr.rel (!%p17_p3) target bundleno = 3 (0x3), region = 83 }
 0x304   :  { %1286 = vsyncpa [#allocation3], 1 }
 0x305   :  { %1288 = vsyncpa [#allocation3 + $0x1], 1 }

</bundles_post_ra>
